<compile_context>
chip_gen: v7x
topology: tpu7x:2x2x1
jax: 0.10.0
libtpu: 0.0.40
codegen_flags: <defaults>
</compile_context>

<pallas_src>
import functools

import jax
import jax.numpy as jnp
from jax.experimental import pallas as pl
from jax.experimental.pallas import tpu as pltpu


def _tv_kernel(x_ref, m_ref, o_ref, *, width, valid_rows_last, last_step):
    """One grid step: TB flattened (H*W) planes -> one normalized partial sum."""

    def tv_partial(x):
        # Horizontal pairs: cyclic offset-1 diffs; the spurious row-wrap terms
        # (lane % W == 0) are zeroed by m_ref[0], which also folds in
        # 2*weight/(B*count_w).
        d1 = x - pltpu.roll(x, 1, axis=1)
        s = jnp.sum(d1 * d1 * m_ref[0:1, :])
        # Vertical pairs: cyclic offset-W diffs; the spurious plane-wrap terms
        # (lane < W) are zeroed by m_ref[1], which folds in 2*weight/(B*count_h).
        dw = x - pltpu.roll(x, width, axis=1)
        return s + jnp.sum(dw * dw * m_ref[1:2, :])

    def emit(x):
        # Lane-dense (8, 128) tile -> unmasked stores; scalar replicated,
        # wrapper reads element [0, 0] of each block.
        o_ref[...] = jnp.full(o_ref.shape, tv_partial(x), jnp.float32)

    tb = x_ref.shape[0]
    if valid_rows_last == tb:
        # Every block is fully valid: no per-element masking anywhere.
        emit(x_ref[...].astype(jnp.float32))
    else:
        @pl.when(pl.program_id(0) != last_step)
        def _():
            emit(x_ref[...].astype(jnp.float32))

        @pl.when(pl.program_id(0) == last_step)
        def _():
            # Ragged tail: rows past the end of the array hold unspecified
            # data -> zero them (zero rows contribute exactly zero).
            x = x_ref[...].astype(jnp.float32)
            rows = jax.lax.broadcasted_iota(jnp.int32, x.shape, 0)
            emit(jnp.where(rows < valid_rows_last, x, 0.0))


def l_tv_loss(x, tv_loss_weight=1.0):
    """Pallas TPU implementation of L_TV.forward for NCHW input x."""
    b, c, h, w = x.shape
    p = b * c
    hw = h * w
    count_h = (h - 1) * w          # number of vertical-diff terms
    count_w = h * (w - 1)          # number of horizontal-diff terms
    scale = 2.0 * tv_loss_weight / b

    itemsize = x.dtype.itemsize
    plane_bytes = hw * itemsize

    _TARGET_BLOCK = 8 * 1024 * 1024   # ~8 MiB blocks amortize per-step overhead
    _MAX_BLOCK = 8 * 1024 * 1024      # keeps 2x(input)+intermediates << 64 MiB (v7x)

    if 8 * plane_bytes > _MAX_BLOCK:
        # TODO(synk): tile the flattened H*W (lane) axis with a W-element halo
        # for very large planes instead of this plain-JAX fallback.
        xf32 = x.astype(jnp.float32)
        h_tv = jnp.sum((xf32[:, :, 1:, :] - xf32[:, :, :-1, :]) ** 2)
        w_tv = jnp.sum((xf32[:, :, :, 1:] - xf32[:, :, :, :-1]) ** 2)
        return scale * (h_tv / count_h + w_tv / count_w)

    # Planes per block: multiple of 8 (sublane tiling), rounded DOWN from the
    # byte target, never exceeding the array (no pad copy of x).
    if p <= 8:
        tb = p
    else:
        tb = max(8, (_TARGET_BLOCK // plane_bytes) // 8 * 8)
        tb = min(tb, (p // 8) * 8)
        if -(-p // tb) < 2 and tb > 8:
            tb = max(8, (tb // 2) // 8 * 8)   # grid >= 2: use both v7x TensorCores
    g = -(-p // tb)                            # cdiv
    valid_last = p - (g - 1) * tb              # valid rows in the last block
    block_bytes = tb * hw * itemsize

    # (2, H*W) mask/normalization table, fetched once and VMEM-resident
    # (constant index_map). Row 0: horizontal validity * 2*weight/(B*count_w);
    # row 1: vertical validity * 2*weight/(B*count_h).
    lane = jnp.arange(hw, dtype=jnp.int32)
    inv_w = scale / max(count_w, 1)   # max() only guards degenerate W==1 / H==1
    inv_h = scale / max(count_h, 1)
    masks = jnp.stack(
        [jnp.where(lane % w != 0, inv_w, 0.0),
         jnp.where(lane >= w, inv_h, 0.0)],
        axis=0,
    ).astype(jnp.float32)

    xf = x.reshape(p, hw)   # every (H, W) plane becomes one lane-dense row

    partials = pl.pallas_call(
        functools.partial(_tv_kernel, width=w,
                          valid_rows_last=valid_last, last_step=g - 1),
        out_shape=jax.ShapeDtypeStruct((g * 8, 128), jnp.float32),
        grid=(g,),
        in_specs=[
            pl.BlockSpec((tb, hw), lambda i: (i, 0)),
            pl.BlockSpec((2, hw), lambda i: (0, 0)),
        ],
        out_specs=pl.BlockSpec((8, 128), lambda i: (i, 0)),
        compiler_params=pltpu.CompilerParams(
            dimension_semantics=("parallel",),
            vmem_limit_bytes=int(min(48 * 1024 * 1024,
                                     5 * block_bytes + 4 * 1024 * 1024)),
        ),
        cost_estimate=pl.CostEstimate(
            flops=9 * p * hw,
            transcendentals=0,
            bytes_accessed=p * hw * itemsize + 2 * hw * 4 + g * 8 * 128 * 4,
        ),
    )(xf, masks)

    # One normalized partial per grid step (replicated across its (8,128) tile).
    return jnp.sum(partials[::8, 0])


def _reference(x, weight=1.0):
    """Pure-JAX transcription of the PyTorch L_TV.forward."""
    b, _, h, w = x.shape
    count_h = (h - 1) * w
    count_w = h * (w - 1)
    h_tv = jnp.sum((x[:, :, 1:, :] - x[:, :, :-1, :]) ** 2)
    w_tv = jnp.sum((x[:, :, :, 1:] - x[:, :, :, :-1]) ** 2)
    return weight * 2.0 * (h_tv / count_h + w_tv / count_w) / b


if __name__ == "__main__":
    key = jax.random.PRNGKey(0)

    # Primary shape: B*C = 8 planes -> single block, no tail masking.
    x = jax.random.uniform(key, (2, 4, 16, 16), dtype=jnp.float32)
    loss = jax.block_until_ready(jax.jit(l_tv_loss)(x))
    ref = _reference(x)
    assert jnp.allclose(loss, ref, rtol=1e-5, atol=1e-6), (loss, ref)

    # Second shape: B*C = 10 planes -> 2 grid steps, ragged last block masked
    # in-kernel (exercises the no-pad tail path).
    x2 = jax.random.uniform(jax.random.split(key)[0], (2, 5, 16, 16),
                            dtype=jnp.float32)
    loss2 = jax.block_until_ready(jax.jit(l_tv_loss)(x2))
    ref2 = _reference(x2)
    assert jnp.allclose(loss2, ref2, rtol=1e-5, atol=1e-6), (loss2, ref2)

    print("KERNEL_OK")
</pallas_src>

<mosaic_0001>
module attributes {stable_mosaic.version = 11 : i64} {
  func.func @_tv_kernel(%arg0: i32, %arg1: memref<8x256xf32, #tpu.memory_space<vmem>>, %arg2: memref<2x256xf32, #tpu.memory_space<vmem>>, %arg3: memref<8x128xf32, #tpu.memory_space<vmem>>) attributes {dimension_semantics = [#tpu.dimension_semantics<parallel>], iteration_bounds = array<i64: 1>, scalar_prefetch = 0 : i64, scratch_operands = 0 : i64, tpu.core_type = #tpu.core_type<tc>, window_params = [{transform_indices = @transform_0, window_bounds = array<i64: 8, 256>}, {pipeline_mode = #tpu.pipeline_mode<synchronous>, transform_indices = @transform_1, window_bounds = array<i64: 2, 256>}, {transform_indices = @transform_2, window_bounds = array<i64: 8, 128>}]} {
    %c0 = arith.constant 0 : index
    %c0_0 = arith.constant 0 : index
    %0 = vector.load %arg1[%c0, %c0_0] : memref<8x256xf32, #tpu.memory_space<vmem>>, vector<8x256xf32>
    %c1_i32 = arith.constant 1 : i32
    %1 = tpu.dynamic_rotate %0 by %c1_i32 dim 1 : vector<8x256xf32>, i32 -> vector<8x256xf32>
    %2 = arith.subf %0, %1 : vector<8x256xf32>
    %3 = arith.mulf %2, %2 : vector<8x256xf32>
    %c0_1 = arith.constant 0 : index
    %c0_2 = arith.constant 0 : index
    %4 = vector.load %arg2[%c0_1, %c0_2] : memref<2x256xf32, #tpu.memory_space<vmem>>, vector<1x256xf32>
    %5 = vector.broadcast %4 : vector<1x256xf32> to vector<8x256xf32>
    %6 = arith.mulf %3, %5 : vector<8x256xf32>
    %7 = vector.shape_cast %6 : vector<8x256xf32> to vector<1x8x256xf32>
    %cst = arith.constant dense<0.000000e+00> : vector<1xf32>
    %8 = vector.multi_reduction <add>, %7, %cst [1, 2] : vector<1x8x256xf32> to vector<1xf32>
    %9 = vector.shape_cast %8 : vector<1xf32> to vector<1x1x1xf32>
    %10 = vector.extract %9[0, 0, 0] : f32 from vector<1x1x1xf32>
    %c16_i32 = arith.constant 16 : i32
    %11 = tpu.dynamic_rotate %0 by %c16_i32 dim 1 : vector<8x256xf32>, i32 -> vector<8x256xf32>
    %12 = arith.subf %0, %11 : vector<8x256xf32>
    %13 = arith.mulf %12, %12 : vector<8x256xf32>
    %c1 = arith.constant 1 : index
    %c0_3 = arith.constant 0 : index
    %14 = vector.load %arg2[%c1, %c0_3] : memref<2x256xf32, #tpu.memory_space<vmem>>, vector<1x256xf32>
    %15 = vector.broadcast %14 : vector<1x256xf32> to vector<8x256xf32>
    %16 = arith.mulf %13, %15 : vector<8x256xf32>
    %17 = vector.shape_cast %16 : vector<8x256xf32> to vector<1x8x256xf32>
    %cst_4 = arith.constant dense<0.000000e+00> : vector<1xf32>
    %18 = vector.multi_reduction <add>, %17, %cst_4 [1, 2] : vector<1x8x256xf32> to vector<1xf32>
    %19 = vector.shape_cast %18 : vector<1xf32> to vector<1x1x1xf32>
    %20 = vector.extract %19[0, 0, 0] : f32 from vector<1x1x1xf32>
    %21 = arith.addf %10, %20 : f32
    %22 = vector.broadcast %21 : f32 to vector<8x128xf32>
    %c0_5 = arith.constant 0 : index
    %c0_6 = arith.constant 0 : index
    %23 = vector.load %arg3[%c0_5, %c0_6] : memref<8x128xf32, #tpu.memory_space<vmem>>, vector<8x128xf32>
    tpu.vector_store %arg3[%c0_5, %c0_6], %22 {strides = array<i32>} : memref<8x128xf32, #tpu.memory_space<vmem>>, vector<8x128xf32>,
    return
  }
  func.func @transform_0(%arg0: i32) -> (i32, i32) {
    %c0_i32 = arith.constant 0 : i32
    %c0_i32_0 = arith.constant 0 : i32
    return %arg0, %c0_i32 : i32, i32
  }
  func.func @transform_1(%arg0: i32) -> (i32, i32) {
    %c0_i32 = arith.constant 0 : i32
    %c0_i32_0 = arith.constant 0 : i32
    %c0_i32_1 = arith.constant 0 : i32
    return %c0_i32, %c0_i32_0 : i32, i32
  }
  func.func @transform_2(%arg0: i32) -> (i32, i32) {
    %c0_i32 = arith.constant 0 : i32
    %c0_i32_0 = arith.constant 0 : i32
    return %arg0, %c0_i32 : i32, i32
  }
}

</mosaic_0001>

<bundles_post_ra>
// kernel: l_tv_loss.1
= control target key start
LH: loop header
LB: loop body
LE: loop exit
PB: predicated region body
PF: predicated region fallthrough
CT: control target
= control target key end

     0   :  { %s100_s11 = smov 16   ;;  %s101_s12 = smov 1   ;;  %v17_v2 = vlaneseq  ;;  %s132_s0 = inlined_call_operand.vmem [shape: f32[8,256], index: 0, kind: input, shape index: {}]   ;;  %s133_s1 = inlined_call_operand.vmem [shape: f32[2,256], index: 1, kind: input, shape index: {}]   ;;  %s134_s2 = inlined_call_operand.vmem [shape: f32[8,128], index: 2, kind: output, shape index: {}]  }
   0x1   :  { %v11_v0 = vld [vmem:[%s132_s0] sm:$0xff]  ;;  %v12_v1 = vld [vmem:[%s132_s0 + $0x8] sm:$0xff] }
   0x2   :  { %50 = vrot.lane.b32.xlu1 %v11_v0, %s100_s11  ;;  %13 = vrot.lane.b32.xlu0 %v11_v0, %s101_s12  ;;  %v29_v3 = vshrl.u32 %v17_v2, 7  ;;  %v18_v4 = vand.u32 127, %v17_v2  ;;  %v93_v9 = vld [vmem:[%s133_s1 + $0x1] ss:$2 sm:$0x3] }
   0x3   :  { %v26_v10 = vld [vmem:[%s133_s1] ss:$2 sm:$0x3] }
   0x4   :  { %v30_v7 = vsub.s32 0, %v29_v3  ;;  %v34_v8 = vsub.s32 1, %v29_v3  ;;  %vm54_vm0 = vcmp.lt.s32.totalorder %v18_v4, 16  ;;  %vm19_vm1 = vcmp.lt.s32.totalorder %v18_v4, 1 }
   0x6   :  { %52 = vrot.lane.b32.xlu1 %v12_v1, %s100_s11  ;;  %15 = vrot.lane.b32.xlu0 %v12_v1, %s101_s12  ;;  %v67_v13 = vrot.slane %v93_v9, %v30_v7  ;;  %v71_v14 = vrot.slane %v93_v9, %v34_v8  ;;  %v31_v15 = vrot.slane %v26_v10, %v30_v7 }
   0x7   :  { %v35_v16 = vrot.slane %v26_v10, %v34_v8 }
  0x74   :  { %v51_v5 = vpop.permute.xlu1 %50  ;;  %v14_v6 = vpop.permute.xlu0 %13 }
  0x78   :  { %v53_v11 = vpop.permute.xlu1 %52  ;;  %v16_v12 = vpop.permute.xlu0 %15 }
  0x79   :  { %v55_v17 = vsel %vm54_vm0, %v51_v5, %v53_v11  ;;  %v56_v18 = vsel %vm54_vm0, %v53_v11, %v51_v5  ;;  %v20_v19 = vsel %vm19_vm1, %v14_v6, %v16_v12  ;;  %v21_v20 = vsel %vm19_vm1, %v16_v12, %v14_v6 }
  0x7a   :  { %v57_v21 = vsub.f32 %v11_v0, %v56_v18  ;;  %v58_v22 = vsub.f32 %v12_v1, %v55_v17  ;;  %v22_v23 = vsub.f32 %v11_v0, %v21_v20  ;;  %v23_v24 = vsub.f32 %v12_v1, %v20_v19 }
  0x7c   :  { %v59_v25 = vmul.f32 %v57_v21, %v57_v21  ;;  %v60_v26 = vmul.f32 %v58_v22, %v58_v22  ;;  %v24_v27 = vmul.f32 %v22_v23, %v22_v23  ;;  %v25_v28 = vmul.f32 %v23_v24, %v23_v24 }
  0x7e   :  { %v74_v29 = vmul.f32 %v67_v13, %v59_v25  ;;  %v75_v30 = vmul.f32 %v71_v14, %v60_v26  ;;  %v38_v31 = vmul.f32 %v31_v15, %v24_v27  ;;  %v39_v32 = vmul.f32 %v35_v16, %v25_v28 }
  0x80   :  { %v76_v33 = vadd.f32 %v75_v30, %v74_v29  ;;  %v40_v34 = vadd.f32 %v39_v32, %v38_v31 }
  0x82   :  { %77 = vadd.xlane.f32.xlu1 %v76_v33  ;;  %41 = vadd.xlane.f32.xlu0 %v40_v34 }
 0x10f   :  { %v78_v35 = vpop.xlane.xlu1 %77  ;;  %v42_v36 = vpop.xlane.xlu0 %41 }
 0x110   :  { %v79_v37 = vrot.slane %v78_v35, 4  ;;  %v43_v38 = vrot.slane %v42_v36, 4 }
 0x112   :  { %v80_v39 = vadd.f32 %v79_v37, %v78_v35  ;;  %v44_v40 = vadd.f32 %v43_v38, %v42_v36 }
 0x114   :  { %v81_v41 = vrot.slane %v80_v39, 2  ;;  %v45_v42 = vrot.slane %v44_v40, 2 }
 0x116   :  { %v82_v43 = vadd.f32 %v81_v41, %v80_v39  ;;  %v46_v44 = vadd.f32 %v45_v42, %v44_v40 }
 0x118   :  { %v47_v45 = vrot.slane %v46_v44, 1  ;;  %v83_v46 = vrot.slane %v82_v43, 1 }
 0x11a   :  { %v48_v47 = vadd.f32 %v47_v45, %v46_v44  ;;  %v84_v48 = vadd.f32 %v83_v46, %v82_v43 }
 0x11c   :  { %94 = vpush %v48_v47 }
 0x11d   :  { %96 = vpush %v84_v48 }
 0x14d   :  { %s95_s0 = spop %94 }
 0x14e   :  { %s97_s1 = spop %96 }
 0x14f   :  { %s86_s19 = sadd.f32 %s97_s1, %s95_s0 }
 0x151   :  { %v87_v49 = vstv %s86_s19 }
 0x152   :  { %88 = vst [vmem:[%s134_s2] sm:$0xff] %v87_v49 }

</bundles_post_ra>
